<compile_context>
chip_gen: v7x
topology: tpu7x:2x2x1
jax: 0.10.0
libtpu: 0.0.40
codegen_flags: <defaults>
</compile_context>

<pallas_src>
import functools

import jax
import jax.numpy as jnp
from jax.experimental import pallas as pl
from jax.experimental.pallas import tpu as pltpu

_INV_SQRT2 = 0.7071067811865476
_HID_CHUNK = 512          # max hidden rows processed per grid step


def _mlp_kernel(x_ref, w1t_ref, b1_ref, w2t_ref, b2_ref, o_ref, acc_ref):
    # Grid: (batch, spatial-tile, hidden-chunk).  The hidden chunk (innermost,
    # "arbitrary") is a reduction into the f32 accumulator scratch.
    # x_ref:   (1, Cin, TS)   channels on sublanes, spatial on lanes
    # w1t_ref: (TK, Cin)      fc1 weight chunk (== Conv3d weight[:, :, 0, 0, 0])
    # b1_ref:  (TK, 1)   f32
    # w2t_ref: (Cout, TK)     fc2 weight chunk
    # b2_ref:  (Cout, 1) f32
    # o_ref:   (1, Cout, TS)
    # acc_ref: (Cout, TS) f32 scratch
    k = pl.program_id(2)

    @pl.when(k == 0)
    def _():
        acc_ref[...] = jnp.zeros_like(acc_ref)

    x = x_ref[0]                                                   # (Cin, TS)
    h = jnp.dot(w1t_ref[...], x, preferred_element_type=jnp.float32)
    h = h + b1_ref[...]                               # lane-broadcast f32 bias
    # Exact erf GELU, matching torch.nn.GELU() default.  (The tanh/EUP variant
    # is faster when VALU-bound but numerics-visible, so it is not used.)
    h = 0.5 * h * (1.0 + jax.lax.erf(h * _INV_SQRT2))
    h = h.astype(w2t_ref.dtype)                 # native MXU dtype path for fc2
    acc_ref[...] += jnp.dot(w2t_ref[...], h, preferred_element_type=jnp.float32)

    @pl.when(k == pl.num_programs(2) - 1)
    def _():
        # Dropout(p=0.0) is identity in the forward pass.
        # TODO(synk): training-mode dropout (p > 0) is not implemented here.
        o_ref[0] = (acc_ref[...] + b2_ref[...]).astype(o_ref.dtype)


def _round_up(x, m):
    return (x + m - 1) // m * m


@functools.partial(jax.jit, static_argnums=(5,))
def _mlp_pallas_impl(x_ncdhw, w1, b1, w2, b2, single_buffer_weights):
    n, c_in, d, h, w = x_ncdhw.shape
    hid = w1.shape[1]
    c_out = w2.shape[1]
    s = d * h * w

    in_b = jnp.dtype(x_ncdhw.dtype).itemsize
    w_b = jnp.dtype(w1.dtype).itemsize

    # ---- hidden-dim chunking (innermost, "arbitrary" reduction axis). ----
    if hid <= _HID_CHUNK:
        tk, hid_pad = hid, hid
    else:
        tk = _HID_CHUNK
        hid_pad = _round_up(hid, tk)
    kh = hid_pad // tk

    # NCDHW -> (N, Cin, S): collapsing contiguous trailing dims is free.
    x3 = x_ncdhw.reshape(n, c_in, s)
    w1t = jnp.transpose(w1)                        # (Hid, Cin)  -- tiny, once
    w2t = jnp.transpose(w2)                        # (Cout, Hid)
    b1c = b1.astype(jnp.float32).reshape(hid, 1)   # f32: no per-step casts
    b2c = b2.astype(jnp.float32).reshape(c_out, 1)
    if hid_pad != hid:
        # Zero-padded hidden rows are inert: gelu(0)=0 and the padded fc2
        # columns are zero, so they add nothing to the accumulator.
        w1t = jnp.pad(w1t, ((0, hid_pad - hid), (0, 0)))
        w2t = jnp.pad(w2t, ((0, 0), (0, hid_pad - hid)))
        b1c = jnp.pad(b1c, ((0, hid_pad - hid), (0, 0)))

    # ---- generation-aware VMEM budget (128 MiB v5e/v6e, 64 MiB v7x). ----
    try:
        vmem_cap = int(pltpu.get_tpu_info().vmem_capacity_bytes)
    except Exception:
        vmem_cap = 64 * 2 ** 20                    # conservative fallback
    tile_budget = vmem_cap // 4                    # 16 MiB v7x, 32 MiB v5e/v6e

    use_sb = single_buffer_weights and hasattr(pl, "Buffered")
    sb_w = use_sb and kh == 1        # w1t/b1/w2t grid-invariant only un-chunked
    w_copies = 1 if sb_w else 2
    # Weights/biases resident in VMEM ((*, 1) bias blocks pad lanes to 128).
    w_bytes = (w_copies * (tk * c_in + c_out * tk) * w_b
               + w_copies * tk * 128 * 4
               + (1 if use_sb else 2) * c_out * 128 * 4)
    # Per-spatial-lane bytes: double-buffered x/out blocks, f32 accumulator,
    # f32 hidden intermediate (+ cast copy and slack).
    lane_bytes = (2 * c_in * in_b + 2 * c_out * in_b + 4 * c_out
                  + tk * (8 + w_b))
    ts_cap = max(256, min(16384,
                          max(0, tile_budget - w_bytes) // lane_bytes // 128 * 128))

    ts = min(ts_cap, _round_up(s, 128))
    n_tiles = pl.cdiv(s, ts)
    # v7x megacore: prefer an even number of parallel grid steps so both
    # TensorCores get balanced shards (near-free on single-core chips).
    if n % 2 == 1 and n_tiles % 2 == 1 and s > 128:
        ts_even = _round_up(pl.cdiv(s, n_tiles + 1), 128)
        if pl.cdiv(s, ts_even) % 2 == 0:
            ts = ts_even
            n_tiles = pl.cdiv(s, ts)

    # No wrapper-side pad/crop of the spatial axis: the trailing partial block
    # is handled by Pallas (masked tail stores; garbage tail lanes only feed
    # pointwise ops and are never written back, nothing mixes lanes).

    est = (2 * ts * (c_in + c_out) * in_b          # double-buffered x / out
           + ts * c_out * 4                        # f32 accumulator
           + ts * tk * (4 + w_b)                   # f32 hidden + cast copy
           + w_bytes + (2 << 20))                  # weights + slack
    vmem_limit = int(min((3 * vmem_cap) // 4, max(32 * 2 ** 20, 2 * est)))

    wkw = {"pipeline_mode": pl.Buffered(1)} if sb_w else {}
    bkw = {"pipeline_mode": pl.Buffered(1)} if use_sb else {}

    out3 = pl.pallas_call(
        _mlp_kernel,
        out_shape=jax.ShapeDtypeStruct((n, c_out, s), x_ncdhw.dtype),
        grid_spec=pltpu.PrefetchScalarGridSpec(
            num_scalar_prefetch=0,
            grid=(n, n_tiles, kh),
            in_specs=[
                # x block index is independent of k -> fetched once per (b, j).
                pl.BlockSpec((1, c_in, ts), lambda b, j, k: (b, 0, j)),
                pl.BlockSpec((tk, c_in), lambda b, j, k: (k, 0), **wkw),
                pl.BlockSpec((tk, 1), lambda b, j, k: (k, 0), **wkw),
                pl.BlockSpec((c_out, tk), lambda b, j, k: (0, k), **wkw),
                pl.BlockSpec((c_out, 1), lambda b, j, k: (0, 0), **bkw),
            ],
            out_specs=pl.BlockSpec((1, c_out, ts), lambda b, j, k: (b, 0, j)),
            scratch_shapes=[pltpu.VMEM((c_out, ts), jnp.float32)],
        ),
        compiler_params=pltpu.CompilerParams(
            dimension_semantics=("parallel", "parallel", "arbitrary"),
            vmem_limit_bytes=vmem_limit),
    )(x3, w1t, b1c, w2t, b2c)

    return out3.reshape(n, c_out, d, h, w)


_SINGLE_BUFFER_OK = True


def mlp_pallas(x_ncdhw, w1, b1, w2, b2):
    """x_ncdhw: (N, Cin, D, H, W); w1: (Cin, Hid); b1: (Hid,); w2: (Hid, Cout); b2: (Cout,)."""
    global _SINGLE_BUFFER_OK
    if _SINGLE_BUFFER_OK:
        try:
            return _mlp_pallas_impl(x_ncdhw, w1, b1, w2, b2, True)
        except Exception:
            # pl.Buffered(1) pipeline_mode unsupported on this JAX/libtpu:
            # fall back to default double-buffered weight specs.
            _SINGLE_BUFFER_OK = False
    return _mlp_pallas_impl(x_ncdhw, w1, b1, w2, b2, False)


def mlp_reference(x_ncdhw, w1, b1, w2, b2):
    """Pure-JAX reference of the PyTorch forward (1x1x1 conv == channel matmul)."""
    n, c, d, hh, w = x_ncdhw.shape
    x = x_ncdhw.reshape(n, c, -1).astype(jnp.float32)
    h = jnp.einsum("nci,ce->nei", x, w1.astype(jnp.float32)) \
        + b1.astype(jnp.float32)[None, :, None]
    h = 0.5 * h * (1.0 + jax.lax.erf(h / jnp.sqrt(2.0)))
    o = jnp.einsum("nei,ef->nfi", h, w2.astype(jnp.float32)) \
        + b2.astype(jnp.float32)[None, :, None]
    return o.reshape(n, -1, d, hh, w).astype(x_ncdhw.dtype)


if __name__ == "__main__":
    key = jax.random.PRNGKey(0)
    ks = jax.random.split(key, 10)

    # --- Test 1: small config, single hidden chunk (kh == 1), even batch. ---
    N, Cin, Hid, Cout, D, H, W = 2, 4, 8, 4, 4, 8, 8
    x = jax.random.normal(ks[0], (N, Cin, D, H, W), dtype=jnp.float32)
    w1 = jax.random.normal(ks[1], (Cin, Hid), dtype=jnp.float32) * 0.1
    b1 = jax.random.normal(ks[2], (Hid,), dtype=jnp.float32) * 0.1
    w2 = jax.random.normal(ks[3], (Hid, Cout), dtype=jnp.float32) * 0.1
    b2 = jax.random.normal(ks[4], (Cout,), dtype=jnp.float32) * 0.1

    out = jax.block_until_ready(mlp_pallas(x, w1, b1, w2, b2))
    ref = mlp_reference(x, w1, b1, w2, b2)
    assert out.shape == (N, Cout, D, H, W), out.shape
    assert jnp.allclose(out, ref, atol=2e-5, rtol=2e-5), \
        float(jnp.max(jnp.abs(out - ref)))

    # --- Test 2: hidden chunking (kh > 1), ragged spatial tail, odd batch. ---
    N2, Cin2, Hid2, Cout2, D2, H2, W2 = 1, 16, 640, 8, 3, 8, 8
    x2 = jax.random.normal(ks[5], (N2, Cin2, D2, H2, W2), dtype=jnp.float32)
    w1b = jax.random.normal(ks[6], (Cin2, Hid2), dtype=jnp.float32) * 0.05
    b1b = jax.random.normal(ks[7], (Hid2,), dtype=jnp.float32) * 0.05
    w2b = jax.random.normal(ks[8], (Hid2, Cout2), dtype=jnp.float32) * 0.05
    b2b = jax.random.normal(ks[9], (Cout2,), dtype=jnp.float32) * 0.05

    out2 = jax.block_until_ready(mlp_pallas(x2, w1b, b1b, w2b, b2b))
    ref2 = mlp_reference(x2, w1b, b1b, w2b, b2b)
    assert out2.shape == (N2, Cout2, D2, H2, W2), out2.shape
    assert jnp.allclose(out2, ref2, atol=1e-3, rtol=1e-3), \
        float(jnp.max(jnp.abs(out2 - ref2)))

    print("KERNEL_OK")
</pallas_src>

<mosaic_0001>
module attributes {stable_mosaic.version = 11 : i64} {
  func.func @_mlp_kernel(%arg0: i32, %arg1: i32, %arg2: i32, %arg3: memref<1x4x256xf32, #tpu.memory_space<vmem>>, %arg4: memref<8x4xf32, #tpu.memory_space<vmem>>, %arg5: memref<8x1xf32, #tpu.memory_space<vmem>>, %arg6: memref<4x8xf32, #tpu.memory_space<vmem>>, %arg7: memref<4x1xf32, #tpu.memory_space<vmem>>, %arg8: memref<1x4x256xf32, #tpu.memory_space<vmem>>, %arg9: memref<4x256xf32, #tpu.memory_space<vmem>>) attributes {dimension_semantics = [#tpu.dimension_semantics<parallel>, #tpu.dimension_semantics<parallel>, #tpu.dimension_semantics<arbitrary>], iteration_bounds = array<i64: 2, 1, 1>, scalar_prefetch = 0 : i64, scratch_operands = 1 : i64, tpu.core_type = #tpu.core_type<tc>, window_params = [{transform_indices = @transform_0, window_bounds = array<i64: 1, 4, 256>}, {pipeline_mode = #tpu.pipeline_mode<synchronous>, transform_indices = @transform_1, window_bounds = array<i64: 8, 4>}, {pipeline_mode = #tpu.pipeline_mode<synchronous>, transform_indices = @transform_2, window_bounds = array<i64: 8, 1>}, {pipeline_mode = #tpu.pipeline_mode<synchronous>, transform_indices = @transform_3, window_bounds = array<i64: 4, 8>}, {pipeline_mode = #tpu.pipeline_mode<synchronous>, transform_indices = @transform_4, window_bounds = array<i64: 4, 1>}, {transform_indices = @transform_5, window_bounds = array<i64: 1, 4, 256>}]} {
    %c0_i32 = arith.constant 0 : i32
    %0 = arith.cmpi eq, %arg2, %c0_i32 : i32
    %1 = arith.extui %0 : i1 to i32
    %c0_i32_0 = arith.constant 0 : i32
    %2 = arith.cmpi ne, %1, %c0_i32_0 : i32
    scf.if %2 {
      %cst_19 = arith.constant 0.000000e+00 : f32
      %26 = vector.broadcast %cst_19 : f32 to vector<4x256xf32>
      %c0_20 = arith.constant 0 : index
      %c0_21 = arith.constant 0 : index
      %27 = vector.load %arg9[%c0_20, %c0_21] : memref<4x256xf32, #tpu.memory_space<vmem>>, vector<4x256xf32>
      tpu.vector_store %arg9[%c0_20, %c0_21], %26 {strides = array<i32>} : memref<4x256xf32, #tpu.memory_space<vmem>>, vector<4x256xf32>,
    } else {
    }
    %c0 = arith.constant 0 : index
    %c0_1 = arith.constant 0 : index
    %c0_2 = arith.constant 0 : index
    %3 = vector.load %arg3[%c0, %c0_1, %c0_2] : memref<1x4x256xf32, #tpu.memory_space<vmem>>, vector<1x4x256xf32>
    %4 = vector.shape_cast %3 : vector<1x4x256xf32> to vector<4x256xf32>
    %c0_3 = arith.constant 0 : index
    %c0_4 = arith.constant 0 : index
    %5 = vector.load %arg4[%c0_3, %c0_4] : memref<8x4xf32, #tpu.memory_space<vmem>>, vector<8x4xf32>
    %cst = arith.constant dense<0.000000e+00> : vector<8x256xf32>
    %6 = tpu.matmul %5, %4, %cst {dimension_numbers = #tpu.dot_dimension_numbers<[1], [0], [0], [1], [0, 0, 1, 1], [], []>} : vector<8x4xf32>, vector<4x256xf32>, vector<8x256xf32> -> vector<8x256xf32>
    %c0_5 = arith.constant 0 : index
    %c0_6 = arith.constant 0 : index
    %7 = vector.load %arg5[%c0_5, %c0_6] : memref<8x1xf32, #tpu.memory_space<vmem>>, vector<8x1xf32>
    %8 = vector.broadcast %7 : vector<8x1xf32> to vector<8x256xf32>
    %9 = arith.addf %6, %8 : vector<8x256xf32>
    %cst_7 = arith.constant 5.000000e-01 : f32
    %10 = vector.broadcast %cst_7 : f32 to vector<8x256xf32>
    %11 = arith.mulf %10, %9 : vector<8x256xf32>
    %cst_8 = arith.constant 0.707106769 : f32
    %12 = vector.broadcast %cst_8 : f32 to vector<8x256xf32>
    %13 = arith.mulf %9, %12 : vector<8x256xf32>
    %14 = math.erf %13 : vector<8x256xf32>
    %cst_9 = arith.constant 1.000000e+00 : f32
    %15 = vector.broadcast %cst_9 : f32 to vector<8x256xf32>
    %16 = arith.addf %15, %14 : vector<8x256xf32>
    %17 = arith.mulf %11, %16 : vector<8x256xf32>
    %c0_10 = arith.constant 0 : index
    %c0_11 = arith.constant 0 : index
    %18 = vector.load %arg9[%c0_10, %c0_11] : memref<4x256xf32, #tpu.memory_space<vmem>>, vector<4x256xf32>
    %c0_12 = arith.constant 0 : index
    %c0_13 = arith.constant 0 : index
    %19 = vector.load %arg6[%c0_12, %c0_13] : memref<4x8xf32, #tpu.memory_space<vmem>>, vector<4x8xf32>
    %cst_14 = arith.constant dense<0.000000e+00> : vector<4x256xf32>
    %20 = tpu.matmul %19, %17, %cst_14 {dimension_numbers = #tpu.dot_dimension_numbers<[1], [0], [0], [1], [0, 0, 1, 1], [], []>} : vector<4x8xf32>, vector<8x256xf32>, vector<4x256xf32> -> vector<4x256xf32>
    %21 = arith.addf %18, %20 : vector<4x256xf32>
    %c0_15 = arith.constant 0 : index
    %c0_16 = arith.constant 0 : index
    %22 = vector.load %arg9[%c0_15, %c0_16] : memref<4x256xf32, #tpu.memory_space<vmem>>, vector<4x256xf32>
    tpu.vector_store %arg9[%c0_15, %c0_16], %21 {strides = array<i32>} : memref<4x256xf32, #tpu.memory_space<vmem>>, vector<4x256xf32>,
    %c0_i32_17 = arith.constant 0 : i32
    %23 = arith.cmpi eq, %arg2, %c0_i32_17 : i32
    %24 = arith.extui %23 : i1 to i32
    %c0_i32_18 = arith.constant 0 : i32
    %25 = arith.cmpi ne, %24, %c0_i32_18 : i32
    scf.if %25 {
      %c0_19 = arith.constant 0 : index
      %c0_20 = arith.constant 0 : index
      %26 = vector.load %arg9[%c0_19, %c0_20] : memref<4x256xf32, #tpu.memory_space<vmem>>, vector<4x256xf32>
      %c0_21 = arith.constant 0 : index
      %c0_22 = arith.constant 0 : index
      %27 = vector.load %arg7[%c0_21, %c0_22] : memref<4x1xf32, #tpu.memory_space<vmem>>, vector<4x1xf32>
      %28 = vector.broadcast %27 : vector<4x1xf32> to vector<4x256xf32>
      %29 = arith.addf %26, %28 : vector<4x256xf32>
      %c0_23 = arith.constant 0 : index
      %c0_24 = arith.constant 0 : index
      %c0_25 = arith.constant 0 : index
      %30 = vector.load %arg8[%c0_23, %c0_24, %c0_25] : memref<1x4x256xf32, #tpu.memory_space<vmem>>, vector<1x4x256xf32>
      %31 = vector.shape_cast %30 : vector<1x4x256xf32> to vector<4x256xf32>
      %32 = vector.shape_cast %29 : vector<4x256xf32> to vector<1x4x256xf32>
      tpu.vector_store %arg8[%c0_23, %c0_24, %c0_25], %32 {strides = array<i32>} : memref<1x4x256xf32, #tpu.memory_space<vmem>>, vector<1x4x256xf32>,
    } else {
    }
    return
  }
  func.func @transform_0(%arg0: i32, %arg1: i32, %arg2: i32) -> (i32, i32, i32) {
    %c0_i32 = arith.constant 0 : i32
    %c0_i32_0 = arith.constant 0 : i32
    return %arg0, %c0_i32, %arg1 : i32, i32, i32
  }
  func.func @transform_1(%arg0: i32, %arg1: i32, %arg2: i32) -> (i32, i32) {
    %c0_i32 = arith.constant 0 : i32
    %c0_i32_0 = arith.constant 0 : i32
    return %arg2, %c0_i32 : i32, i32
  }
  func.func @transform_2(%arg0: i32, %arg1: i32, %arg2: i32) -> (i32, i32) {
    %c0_i32 = arith.constant 0 : i32
    %c0_i32_0 = arith.constant 0 : i32
    return %arg2, %c0_i32 : i32, i32
  }
  func.func @transform_3(%arg0: i32, %arg1: i32, %arg2: i32) -> (i32, i32) {
    %c0_i32 = arith.constant 0 : i32
    %c0_i32_0 = arith.constant 0 : i32
    return %c0_i32, %arg2 : i32, i32
  }
  func.func @transform_4(%arg0: i32, %arg1: i32, %arg2: i32) -> (i32, i32) {
    %c0_i32 = arith.constant 0 : i32
    %c0_i32_0 = arith.constant 0 : i32
    %c0_i32_1 = arith.constant 0 : i32
    return %c0_i32, %c0_i32_0 : i32, i32
  }
  func.func @transform_5(%arg0: i32, %arg1: i32, %arg2: i32) -> (i32, i32, i32) {
    %c0_i32 = arith.constant 0 : i32
    %c0_i32_0 = arith.constant 0 : i32
    return %arg0, %c0_i32, %arg1 : i32, i32, i32
  }
}

module attributes {stable_mosaic.version = 11 : i64} {
  func.func @_mlp_kernel(%arg0: i32, %arg1: i32, %arg2: i32, %arg3: memref<1x4x256xf32, #tpu.memory_space<vmem>>, %arg4: memref<8x4xf32, #tpu.memory_space<vmem>>, %arg5: memref<8x1xf32, #tpu.memory_space<vmem>>, %arg6: memref<4x8xf32, #tpu.memory_space<vmem>>, %arg7: memref<4x1xf32, #tpu.memory_space<vmem>>, %arg8: memref<1x4x256xf32, #tpu.memory_space<vmem>>, %arg9: memref<4x256xf32, #tpu.memory_space<vmem>>) attributes {dimension_semantics = [#tpu.dimension_semantics<parallel>, #tpu.dimension_semantics<parallel>, #tpu.dimension_semantics<arbitrary>], iteration_bounds = array<i64: 2, 1, 1>, scalar_prefetch = 0 : i64, scratch_operands = 1 : i64, tpu.core_type = #tpu.core_type<tc>, window_params = [{transform_indices = @transform_0, window_bounds = array<i64: 1, 4, 256>}, {transform_indices = @transform_1, window_bounds = array<i64: 8, 4>}, {transform_indices = @transform_2, window_bounds = array<i64: 8, 1>}, {transform_indices = @transform_3, window_bounds = array<i64: 4, 8>}, {pipeline_mode = #tpu.pipeline_mode<synchronous>, transform_indices = @transform_4, window_bounds = array<i64: 4, 1>}, {transform_indices = @transform_5, window_bounds = array<i64: 1, 4, 256>}]} {
    %c0_i32 = arith.constant 0 : i32
    %0 = arith.cmpi eq, %arg2, %c0_i32 : i32
    %1 = arith.extui %0 : i1 to i32
    %c0_i32_0 = arith.constant 0 : i32
    %2 = arith.cmpi ne, %1, %c0_i32_0 : i32
    scf.if %2 {
      %cst_19 = arith.constant 0.000000e+00 : f32
      %26 = vector.broadcast %cst_19 : f32 to vector<4x256xf32>
      %c0_20 = arith.constant 0 : index
      %c0_21 = arith.constant 0 : index
      %27 = vector.load %arg9[%c0_20, %c0_21] : memref<4x256xf32, #tpu.memory_space<vmem>>, vector<4x256xf32>
      tpu.vector_store %arg9[%c0_20, %c0_21], %26 {strides = array<i32>} : memref<4x256xf32, #tpu.memory_space<vmem>>, vector<4x256xf32>,
    } else {
    }
    %c0 = arith.constant 0 : index
    %c0_1 = arith.constant 0 : index
    %c0_2 = arith.constant 0 : index
    %3 = vector.load %arg3[%c0, %c0_1, %c0_2] : memref<1x4x256xf32, #tpu.memory_space<vmem>>, vector<1x4x256xf32>
    %4 = vector.shape_cast %3 : vector<1x4x256xf32> to vector<4x256xf32>
    %c0_3 = arith.constant 0 : index
    %c0_4 = arith.constant 0 : index
    %5 = vector.load %arg4[%c0_3, %c0_4] : memref<8x4xf32, #tpu.memory_space<vmem>>, vector<8x4xf32>
    %cst = arith.constant dense<0.000000e+00> : vector<8x256xf32>
    %6 = tpu.matmul %5, %4, %cst {dimension_numbers = #tpu.dot_dimension_numbers<[1], [0], [0], [1], [0, 0, 1, 1], [], []>} : vector<8x4xf32>, vector<4x256xf32>, vector<8x256xf32> -> vector<8x256xf32>
    %c0_5 = arith.constant 0 : index
    %c0_6 = arith.constant 0 : index
    %7 = vector.load %arg5[%c0_5, %c0_6] : memref<8x1xf32, #tpu.memory_space<vmem>>, vector<8x1xf32>
    %8 = vector.broadcast %7 : vector<8x1xf32> to vector<8x256xf32>
    %9 = arith.addf %6, %8 : vector<8x256xf32>
    %cst_7 = arith.constant 5.000000e-01 : f32
    %10 = vector.broadcast %cst_7 : f32 to vector<8x256xf32>
    %11 = arith.mulf %10, %9 : vector<8x256xf32>
    %cst_8 = arith.constant 0.707106769 : f32
    %12 = vector.broadcast %cst_8 : f32 to vector<8x256xf32>
    %13 = arith.mulf %9, %12 : vector<8x256xf32>
    %14 = math.erf %13 : vector<8x256xf32>
    %cst_9 = arith.constant 1.000000e+00 : f32
    %15 = vector.broadcast %cst_9 : f32 to vector<8x256xf32>
    %16 = arith.addf %15, %14 : vector<8x256xf32>
    %17 = arith.mulf %11, %16 : vector<8x256xf32>
    %c0_10 = arith.constant 0 : index
    %c0_11 = arith.constant 0 : index
    %18 = vector.load %arg9[%c0_10, %c0_11] : memref<4x256xf32, #tpu.memory_space<vmem>>, vector<4x256xf32>
    %c0_12 = arith.constant 0 : index
    %c0_13 = arith.constant 0 : index
    %19 = vector.load %arg6[%c0_12, %c0_13] : memref<4x8xf32, #tpu.memory_space<vmem>>, vector<4x8xf32>
    %cst_14 = arith.constant dense<0.000000e+00> : vector<4x256xf32>
    %20 = tpu.matmul %19, %17, %cst_14 {dimension_numbers = #tpu.dot_dimension_numbers<[1], [0], [0], [1], [0, 0, 1, 1], [], []>} : vector<4x8xf32>, vector<8x256xf32>, vector<4x256xf32> -> vector<4x256xf32>
    %21 = arith.addf %18, %20 : vector<4x256xf32>
    %c0_15 = arith.constant 0 : index
    %c0_16 = arith.constant 0 : index
    %22 = vector.load %arg9[%c0_15, %c0_16] : memref<4x256xf32, #tpu.memory_space<vmem>>, vector<4x256xf32>
    tpu.vector_store %arg9[%c0_15, %c0_16], %21 {strides = array<i32>} : memref<4x256xf32, #tpu.memory_space<vmem>>, vector<4x256xf32>,
    %c0_i32_17 = arith.constant 0 : i32
    %23 = arith.cmpi eq, %arg2, %c0_i32_17 : i32
    %24 = arith.extui %23 : i1 to i32
    %c0_i32_18 = arith.constant 0 : i32
    %25 = arith.cmpi ne, %24, %c0_i32_18 : i32
    scf.if %25 {
      %c0_19 = arith.constant 0 : index
      %c0_20 = arith.constant 0 : index
      %26 = vector.load %arg9[%c0_19, %c0_20] : memref<4x256xf32, #tpu.memory_space<vmem>>, vector<4x256xf32>
      %c0_21 = arith.constant 0 : index
      %c0_22 = arith.constant 0 : index
      %27 = vector.load %arg7[%c0_21, %c0_22] : memref<4x1xf32, #tpu.memory_space<vmem>>, vector<4x1xf32>
      %28 = vector.broadcast %27 : vector<4x1xf32> to vector<4x256xf32>
      %29 = arith.addf %26, %28 : vector<4x256xf32>
      %c0_23 = arith.constant 0 : index
      %c0_24 = arith.constant 0 : index
      %c0_25 = arith.constant 0 : index
      %30 = vector.load %arg8[%c0_23, %c0_24, %c0_25] : memref<1x4x256xf32, #tpu.memory_space<vmem>>, vector<1x4x256xf32>
      %31 = vector.shape_cast %30 : vector<1x4x256xf32> to vector<4x256xf32>
      %32 = vector.shape_cast %29 : vector<4x256xf32> to vector<1x4x256xf32>
      tpu.vector_store %arg8[%c0_23, %c0_24, %c0_25], %32 {strides = array<i32>} : memref<1x4x256xf32, #tpu.memory_space<vmem>>, vector<1x4x256xf32>,
    } else {
    }
    return
  }
  func.func @transform_0(%arg0: i32, %arg1: i32, %arg2: i32) -> (i32, i32, i32) {
    %c0_i32 = arith.constant 0 : i32
    %c0_i32_0 = arith.constant 0 : i32
    return %arg0, %c0_i32, %arg1 : i32, i32, i32
  }
  func.func @transform_1(%arg0: i32, %arg1: i32, %arg2: i32) -> (i32, i32) {
    %c0_i32 = arith.constant 0 : i32
    %c0_i32_0 = arith.constant 0 : i32
    return %arg2, %c0_i32 : i32, i32
  }
  func.func @transform_2(%arg0: i32, %arg1: i32, %arg2: i32) -> (i32, i32) {
    %c0_i32 = arith.constant 0 : i32
    %c0_i32_0 = arith.constant 0 : i32
    return %arg2, %c0_i32 : i32, i32
  }
  func.func @transform_3(%arg0: i32, %arg1: i32, %arg2: i32) -> (i32, i32) {
    %c0_i32 = arith.constant 0 : i32
    %c0_i32_0 = arith.constant 0 : i32
    return %c0_i32, %arg2 : i32, i32
  }
  func.func @transform_4(%arg0: i32, %arg1: i32, %arg2: i32) -> (i32, i32) {
    %c0_i32 = arith.constant 0 : i32
    %c0_i32_0 = arith.constant 0 : i32
    %c0_i32_1 = arith.constant 0 : i32
    return %c0_i32, %c0_i32_0 : i32, i32
  }
  func.func @transform_5(%arg0: i32, %arg1: i32, %arg2: i32) -> (i32, i32, i32) {
    %c0_i32 = arith.constant 0 : i32
    %c0_i32_0 = arith.constant 0 : i32
    return %arg0, %c0_i32, %arg1 : i32, i32, i32
  }
}

</mosaic_0001>

<bundles_post_ra>
// kernel: _mlp_pallas_impl.1
= control target key start
LH: loop header
LB: loop body
LE: loop exit
PB: predicated region body
PF: predicated region fallthrough
CT: control target
= control target key end

     0   :  { %s774_s18 = smov 0   ;;  %s776_s19 = smov 0   ;;  %s826_s0 = inlined_call_operand.vmem [shape: f32[2,4,256], index: 0, kind: input, shape index: {}]   ;;  %s827_s1 = inlined_call_operand.vmem [shape: f32[8,4], index: 1, kind: input, shape index: {}]   ;;  %s828_s2 = inlined_call_operand.vmem [shape: f32[8,1], index: 2, kind: input, shape index: {}]   ;;  %s829_s3 = inlined_call_operand.vmem [shape: f32[4,8], index: 3, kind: input, shape index: {}]   ;;  %s830_s4 = inlined_call_operand.vmem [shape: f32[4,1], index: 4, kind: input, shape index: {}]   ;;  %s831_s5 = inlined_call_operand.vmem [shape: f32[2,4,256], index: 5, kind: output, shape index: {}]  }
   0x1   :  { %s778_s20 = smov 0  }
   0x2 LB: > { %s34_s21 = sadd.s32 1, %s735_s19  ;;  %p671_p0 = scmp.ge.s32.totalorder %s739_s20, 1  ;;  %s739_s20 = sphi %s778_s20, %s15_s20   ;;  %s735_s19 = sphi %s776_s19, %s833_s19   ;;  %s731_s18 = sphi %s774_s18, %s832_s18  }
   0x3   : > { %p36_p1 = scmp.ge.s32.totalorder %s34_s21, 2  ;;  %p242_p2 = scmp.lt.s32.totalorder %s739_s20, 3 }
   0x5   : > { %s835_s21 = smov (%p36_p1, %s34_s21), 0  ;;  %p243_p3 = pnand %p671_p0, %p242_p2 }
   0x6   : > { %p291_p4 = scmp.lt.s32.totalorder (!%p243_p3), %s731_s18, 1  ;;  %v741_v0 = vmov (!%p243_p3), 0.0   ;;  %v742_v1 = vmov (!%p243_p3), 0   ;;  %v329_v2 = vld [vmem:[%s828_s2] sm:$0xff] (!%p243_p3)  ;;  %vm341_vm0 = vcmask (!%p243_p3), 1043456   ;;  %vm337_vm1 = vcmask (!%p243_p3), 31744  }
   0x7   : > { %246 = sbr.rel (%p243_p3) target bundleno = 474 (0x1da), region = 40  ;;  %410 = vmatprep.mubr.f32.mxu0 (!%p243_p3), %v741_v0  ;;  %711 = vset.pattern.permute.xlu0 (!%p243_p3), %v742_v1  ;;  %v514_v3 = vld [vmem:[%s830_s4] sm:$0xf] (!%p243_p3)  ;;  %vm429_vm2 = vcmask (!%p243_p3), 64512   ;;  %v743_v23 = vmov (!%p243_p3), 839922192   ;;  %v522_v25 = vlaneseq (!%p243_p3) }
   0x8   : > { %332 = vperm.xlu0 (!%p243_p3), %711, %v329_v2   ;;  %497 = vmatprep.mubr.f32.mxu1 (!%p243_p3), %v741_v0  ;;  %v328_v6 = vld [vmem:[%s827_s1] sm:$0xff] (!%p243_p3)  ;;  %v520_v24 = vunpack.c.l.s4 (!%p243_p3), %v743_v23 }
   0x9   : > { %v428_v22 = vld [vmem:[%s829_s3] sm:$0xf] (!%p243_p3)  ;;  %v523_v27 = vshrl.u32 (!%p243_p3), %v522_v25, 7 }
   0xa   : > { %v521_v26 = vunpack.c.0.s8 (!%p243_p3), %v520_v24 }
   0xc   : > { %517 = vperm.xlu0 (!%p243_p3), %711, %v514_v3   ;;  %v524_v28 = vsub.s32 (!%p243_p3), %v521_v26, %v523_v27 }
   0xe   : > { %s837_s18 = smov (!%p291_p4, %s731_s18), 1 }
   0xf   : > { %s682_s26 = sshll.u32 %s837_s18, 3 }
  0x10   : > { %s298_s29 = scalar_lea.vmem %s826_s0, %s682_s26  ;;  %s320_s11 = scalar_lea.vmem %s831_s5, %s682_s26 }
  0x11   : > { %v327_v4 = vld [vmem:[%s298_s29] sm:$0xff] }
  0x12   : > { %v336_v5 = vcombine.high %v327_v4, %v327_v4 }
  0x14   : > { %676 = vmatprep.subr.msk.mxu0 %vm341_vm0, %v336_v5 }
  0x15   : > { %677 = vmatpush1.msk.msra.mxu0 %vm341_vm0, %v327_v4 }
  0x16   : > { %678 = vmatmul.mubr.msk.f32.vlgmr.msra.gmra.mrb[0].mxu0 %vm337_vm1, %v328_v6 }
  0x87   : > { %v333_v7 = vpop.permute.xlu0 %332 }
  0x8b   : > { %v518_v29 = vpop.permute.xlu0 %517 }
  0x8c   : > { %v525_v32 = vrot.slane %v518_v29, %v524_v28 }
  0xe9   : > { %v412_v8 = vpop.f32.mrb[0].mxu0 }
  0xea   : > { %v413_v9 = vadd.f32 %v412_v8, %v333_v7  ;;  %v414_v10 = vpop.f32.mrb[1].mxu0 }
  0xeb   : > { %v415_v11 = vadd.f32 %v414_v10, %v333_v7 }
  0xec   : > { %v419_v12 = vmul.f32 0.70710677, %v413_v9  ;;  %v417_v19 = vmul.f32 0.5, %v413_v9 }
  0xed   : > { %v420_v13 = vmul.f32 0.70710677, %v415_v11  ;;  %v418_v17 = vmul.f32 0.5, %v415_v11 }
  0xee   : > { %713 = verf.f32 %v419_v12 }
  0xef   : > { %715 = verf.f32 %v420_v13 }
  0xf8   : > { %v714_v14 = vpop.eup %713 }
  0xf9   : > { %v716_v15 = vpop.eup %715  ;;  %v423_v16 = vadd.f32 1.0, %v714_v14 }
  0xfa   : > { %v424_v18 = vadd.f32 1.0, %v716_v15 }
  0xfb   : > { %v425_v21 = vmul.f32 %v423_v16, %v417_v19 }
  0xfc   : > { %v426_v20 = vmul.f32 %v424_v18, %v418_v17 }
  0xfe   : > { %433 = vmatprep.subr.mxu1 %v426_v20 }
  0xff   : > { %434 = vmatpush1.msra.mxu1 %v425_v21 }
 0x100   : > { %679 = vmatmul.mubr.msk.f32.vlgmr.msra.gmra.mrb[0].mxu1 %vm429_vm2, %v428_v22 }
 0x1d3   : > { %v499_v30 = vpop.f32.mrb[0].mxu1 }
 0x1d4   : > { %v501_v31 = vpop.f32.mrb[1].mxu1 }
 0x1d5   : > { %v506_v33 = vcombine.low %v499_v30, %v501_v31 }
 0x1d7   : > { %v527_v34 = vadd.f32 %v525_v32, %v506_v33 }
 0x1d9   : > { %528 = vst [vmem:[%s320_s11] sm:$0xff] %v527_v34 }
 0x1da PF: > { %s15_s20 = sadd.s32 1, %s739_s20   ;;  %s832_s18 = smov %s735_s19 }
 0x1db   : > { %p12_p5 = scmp.ge.s32.totalorder %s15_s20, 4   ;;  %s833_s19 = smov %s835_s21 }
 0x1dd   :  { %14 = sbr.rel (!%p12_p5) target bundleno = 2 (0x2), region = 87 }

// kernel: _mlp_pallas_impl.1
= control target key start
LH: loop header
LB: loop body
LE: loop exit
PB: predicated region body
PF: predicated region fallthrough
CT: control target
= control target key end

     0   :  { %s774_s18 = smov 0   ;;  %s776_s19 = smov 0   ;;  %s826_s0 = inlined_call_operand.vmem [shape: f32[2,4,256], index: 0, kind: input, shape index: {}]   ;;  %s827_s1 = inlined_call_operand.vmem [shape: f32[8,4], index: 1, kind: input, shape index: {}]   ;;  %s828_s2 = inlined_call_operand.vmem [shape: f32[8,1], index: 2, kind: input, shape index: {}]   ;;  %s829_s3 = inlined_call_operand.vmem [shape: f32[4,8], index: 3, kind: input, shape index: {}]   ;;  %s830_s4 = inlined_call_operand.vmem [shape: f32[4,1], index: 4, kind: input, shape index: {}]   ;;  %s831_s5 = inlined_call_operand.vmem [shape: f32[2,4,256], index: 5, kind: output, shape index: {}]  }
   0x1   :  { %s778_s20 = smov 0  }
   0x2 LB: > { %s34_s21 = sadd.s32 1, %s735_s19  ;;  %p671_p0 = scmp.ge.s32.totalorder %s739_s20, 1  ;;  %s739_s20 = sphi %s778_s20, %s15_s20   ;;  %s735_s19 = sphi %s776_s19, %s833_s19   ;;  %s731_s18 = sphi %s774_s18, %s832_s18  }
   0x3   : > { %p36_p1 = scmp.ge.s32.totalorder %s34_s21, 2  ;;  %p242_p2 = scmp.lt.s32.totalorder %s739_s20, 3 }
   0x5   : > { %s835_s21 = smov (%p36_p1, %s34_s21), 0  ;;  %p243_p3 = pnand %p671_p0, %p242_p2 }
   0x6   : > { %p291_p4 = scmp.lt.s32.totalorder (!%p243_p3), %s731_s18, 1  ;;  %v741_v0 = vmov (!%p243_p3), 0.0   ;;  %v742_v1 = vmov (!%p243_p3), 0   ;;  %v329_v2 = vld [vmem:[%s828_s2] sm:$0xff] (!%p243_p3)  ;;  %vm341_vm0 = vcmask (!%p243_p3), 1043456   ;;  %vm337_vm1 = vcmask (!%p243_p3), 31744  }
   0x7   : > { %246 = sbr.rel (%p243_p3) target bundleno = 474 (0x1da), region = 40  ;;  %410 = vmatprep.mubr.f32.mxu0 (!%p243_p3), %v741_v0  ;;  %711 = vset.pattern.permute.xlu0 (!%p243_p3), %v742_v1  ;;  %v514_v3 = vld [vmem:[%s830_s4] sm:$0xf] (!%p243_p3)  ;;  %vm429_vm2 = vcmask (!%p243_p3), 64512   ;;  %v743_v23 = vmov (!%p243_p3), 839922192   ;;  %v522_v25 = vlaneseq (!%p243_p3) }
   0x8   : > { %332 = vperm.xlu0 (!%p243_p3), %711, %v329_v2   ;;  %497 = vmatprep.mubr.f32.mxu1 (!%p243_p3), %v741_v0  ;;  %v328_v6 = vld [vmem:[%s827_s1] sm:$0xff] (!%p243_p3)  ;;  %v520_v24 = vunpack.c.l.s4 (!%p243_p3), %v743_v23 }
   0x9   : > { %v428_v22 = vld [vmem:[%s829_s3] sm:$0xf] (!%p243_p3)  ;;  %v523_v27 = vshrl.u32 (!%p243_p3), %v522_v25, 7 }
   0xa   : > { %v521_v26 = vunpack.c.0.s8 (!%p243_p3), %v520_v24 }
   0xc   : > { %517 = vperm.xlu0 (!%p243_p3), %711, %v514_v3   ;;  %v524_v28 = vsub.s32 (!%p243_p3), %v521_v26, %v523_v27 }
   0xe   : > { %s837_s18 = smov (!%p291_p4, %s731_s18), 1 }
   0xf   : > { %s682_s26 = sshll.u32 %s837_s18, 3 }
  0x10   : > { %s298_s29 = scalar_lea.vmem %s826_s0, %s682_s26  ;;  %s320_s11 = scalar_lea.vmem %s831_s5, %s682_s26 }
  0x11   : > { %v327_v4 = vld [vmem:[%s298_s29] sm:$0xff] }
  0x12   : > { %v336_v5 = vcombine.high %v327_v4, %v327_v4 }
  0x14   : > { %676 = vmatprep.subr.msk.mxu0 %vm341_vm0, %v336_v5 }
  0x15   : > { %677 = vmatpush1.msk.msra.mxu0 %vm341_vm0, %v327_v4 }
  0x16   : > { %678 = vmatmul.mubr.msk.f32.vlgmr.msra.gmra.mrb[0].mxu0 %vm337_vm1, %v328_v6 }
  0x87   : > { %v333_v7 = vpop.permute.xlu0 %332 }
  0x8b   : > { %v518_v29 = vpop.permute.xlu0 %517 }
  0x8c   : > { %v525_v32 = vrot.slane %v518_v29, %v524_v28 }
  0xe9   : > { %v412_v8 = vpop.f32.mrb[0].mxu0 }
  0xea   : > { %v413_v9 = vadd.f32 %v412_v8, %v333_v7  ;;  %v414_v10 = vpop.f32.mrb[1].mxu0 }
  0xeb   : > { %v415_v11 = vadd.f32 %v414_v10, %v333_v7 }
  0xec   : > { %v419_v12 = vmul.f32 0.70710677, %v413_v9  ;;  %v417_v19 = vmul.f32 0.5, %v413_v9 }
  0xed   : > { %v420_v13 = vmul.f32 0.70710677, %v415_v11  ;;  %v418_v17 = vmul.f32 0.5, %v415_v11 }
  0xee   : > { %713 = verf.f32 %v419_v12 }
  0xef   : > { %715 = verf.f32 %v420_v13 }
  0xf8   : > { %v714_v14 = vpop.eup %713 }
  0xf9   : > { %v716_v15 = vpop.eup %715  ;;  %v423_v16 = vadd.f32 1.0, %v714_v14 }
  0xfa   : > { %v424_v18 = vadd.f32 1.0, %v716_v15 }
  0xfb   : > { %v425_v21 = vmul.f32 %v423_v16, %v417_v19 }
  0xfc   : > { %v426_v20 = vmul.f32 %v424_v18, %v418_v17 }
  0xfe   : > { %433 = vmatprep.subr.mxu1 %v426_v20 }
  0xff   : > { %434 = vmatpush1.msra.mxu1 %v425_v21 }
 0x100   : > { %679 = vmatmul.mubr.msk.f32.vlgmr.msra.gmra.mrb[0].mxu1 %vm429_vm2, %v428_v22 }
 0x1d3   : > { %v499_v30 = vpop.f32.mrb[0].mxu1 }
 0x1d4   : > { %v501_v31 = vpop.f32.mrb[1].mxu1 }
 0x1d5   : > { %v506_v33 = vcombine.low %v499_v30, %v501_v31 }
 0x1d7   : > { %v527_v34 = vadd.f32 %v525_v32, %v506_v33 }
 0x1d9   : > { %528 = vst [vmem:[%s320_s11] sm:$0xff] %v527_v34 }
 0x1da PF: > { %s15_s20 = sadd.s32 1, %s739_s20   ;;  %s832_s18 = smov %s735_s19 }
 0x1db   : > { %p12_p5 = scmp.ge.s32.totalorder %s15_s20, 4   ;;  %s833_s19 = smov %s835_s21 }
 0x1dd   :  { %14 = sbr.rel (!%p12_p5) target bundleno = 2 (0x2), region = 87 }

</bundles_post_ra>
